<compile_context>
chip_gen: v5e
topology: v5e:2x2
jax: 0.10.0
libtpu: 0.0.40
codegen_flags: <defaults>
</compile_context>

<pallas_src>
import functools

import jax
import jax.numpy as jnp
import numpy as np
from jax.experimental import pallas as pl
from jax.experimental.pallas import tpu as pltpu


def _round_up(x, m):
    return (x + m - 1) // m * m


def _choose_tiles(n):
    """Return (tile_m, tile_n, padded_n) for the (N, N) depth-loss plane."""
    if n <= 512:
        npad = _round_up(n, 8)
        return npad, npad, npad          # single tile; block == full array dims
    tile = 256                           # sublane mult of 8, lane mult of 128
    return tile, tile, _round_up(n, tile)


def _compass_kernel(acc_ref, pcol_ref, prow_ref, bce_ref, o_ref, *, n):
    """One (tile_m, tile_n) tile of the DepthLossV2 plane + fused BCE.

    Grid: (row tiles i [parallel], col tiles j [arbitrary/reduction]).
    Output block (1, 8, 128), resident across j for each row tile i:
      [0, 0, 0] = sum of |tril residual| over rows of tile i
      [0, 0, 1] = BCEWithLogits mean (same value written for every i)
    """
    i = pl.program_id(0)
    j = pl.program_id(1)
    tm = pcol_ref.shape[0]
    tn = prow_ref.shape[1]
    k = bce_ref.shape[1]

    sub = jax.lax.broadcasted_iota(jnp.int32, (1, 8, 128), 1)
    lane = jax.lax.broadcasted_iota(jnp.int32, (1, 8, 128), 2)

    # --- init the resident output block once per row tile (first j) ---------
    @pl.when(j == 0)
    def _init():
        x = bce_ref[0:1, :]                        # logits  (1, K)
        y = bce_ref[1:2, :]                        # targets (1, K)
        bce = jnp.maximum(x, 0.0) - x * y + jnp.log1p(jnp.exp(-jnp.abs(x)))
        c_loss = jnp.sum(bce) * jnp.float32(1.0 / k)
        o_ref[...] = jnp.where((sub == 0) & (lane == 1), c_loss, 0.0)

    # --- depth loss: only lower-triangle tiles contribute --------------------
    @pl.when(j <= i)
    def _tile():
        acc_step = acc_ref[0, 0]                   # scalar from SMEM

        row_g = jax.lax.broadcasted_iota(jnp.int32, (tm, tn), 0) + i * tm
        col_g = jax.lax.broadcasted_iota(jnp.int32, (tm, tn), 1) + j * tn

        # steps[a, b] = |a - b| * acceptable_step, rebuilt in-kernel (no N^2 DMA).
        # TODO(synk): torch casts `steps` to float16 before the 0.2/0.8 scaling;
        # Mosaic fp16 support is limited, so this stays f32 (<= fp16-eps delta).
        steps = jnp.abs(row_g - col_g).astype(jnp.float32) * acc_step

        d = pcol_ref[...] - prow_ref[...]          # (tm, 1) - (1, tn) -> (tm, tn)
        d1 = jnp.where(d >= 0.0, d - 0.2 * steps, d)
        d2 = jnp.where(d1 >= 0.0, jnp.maximum(d1 - 0.8 * steps, 0.0), d1)

        valid = (row_g >= col_g) & (row_g < n) & (col_g < n)   # tril & un-padded
        tile_sum = jnp.sum(jnp.where(valid, jnp.abs(d2), 0.0))
        o_ref[...] = o_ref[...] + jnp.where((sub == 0) & (lane == 0), tile_sum, 0.0)


def compass_loss(depth_predictions, z_spacing, nth_slice, tumor_prob, bag_label,
                 *, step):
    """Returns (d_loss, cls_loss) exactly like CompassLoss.forward."""
    preds = jnp.asarray(depth_predictions, jnp.float32)[:, 0]      # (N,)
    n = preds.shape[0]
    tm, tn, npad = _choose_tiles(n)
    num_i, num_j = npad // tm, npad // tn

    preds_p = jnp.pad(preds, (0, npad - n))
    pred_col = preds_p.reshape(npad, 1)
    pred_row = preds_p.reshape(1, npad)

    acc_step = (jnp.float32(step) * jnp.asarray(z_spacing, jnp.float32)
                * jnp.asarray(nth_slice, jnp.float32)).reshape(1, 1)

    logits = jnp.asarray(tumor_prob, jnp.float32).reshape(-1)
    labels = jnp.asarray(bag_label, jnp.float32).reshape(-1)
    bce_in = jnp.stack([logits, labels], axis=0)                   # (2, K)
    k = bce_in.shape[1]

    out = pl.pallas_call(
        functools.partial(_compass_kernel, n=n),
        out_shape=jax.ShapeDtypeStruct((num_i, 8, 128), jnp.float32),
        grid=(num_i, num_j),
        in_specs=[
            pl.BlockSpec(memory_space=pltpu.MemorySpace.SMEM),     # acc_step (1,1)
            pl.BlockSpec((tm, 1), lambda i, j: (i, 0)),            # pred column tile
            pl.BlockSpec((1, tn), lambda i, j: (0, j)),            # pred row tile
            pl.BlockSpec((2, k), lambda i, j: (0, 0)),             # fused BCE inputs
        ],
        out_specs=pl.BlockSpec((1, 8, 128), lambda i, j: (i, 0, 0)),
        compiler_params=pltpu.CompilerParams(
            dimension_semantics=("parallel", "arbitrary")),
    )(acc_step, pred_col, pred_row, bce_in)

    # torch: torch.tril(...).abs().sum() / len(predictions) ** 2  -> divide by N*N
    d_loss = jnp.sum(out[:, 0, 0]) / jnp.float32(n * n)
    c_loss = out[0, 0, 1]
    return d_loss, c_loss


def _reference(depth_predictions, z_spacing, nth_slice, tumor_prob, bag_label,
               *, step):
    """Pure-JAX f32 reference of CompassLoss.forward (for sanity checking)."""
    p = jnp.asarray(depth_predictions, jnp.float32)[:, 0]
    m = p.shape[0]
    acc = jnp.float32(step) * jnp.float32(z_spacing) * jnp.float32(nth_slice)
    idx = jnp.arange(m)
    steps = jnp.abs(idx[:, None] - idx[None, :]).astype(jnp.float32) * acc
    d = p[:, None] - p[None, :]
    d1 = jnp.where(d >= 0.0, d - 0.2 * steps, d)
    d2 = jnp.where(d1 >= 0.0, jnp.maximum(d1 - 0.8 * steps, 0.0), d1)
    d_loss = jnp.sum(jnp.abs(jnp.tril(d2))) / (m * m)
    x = jnp.asarray(tumor_prob, jnp.float32).reshape(-1)
    y = jnp.asarray(bag_label, jnp.float32).reshape(-1)
    bce = jnp.maximum(x, 0.0) - x * y + jnp.log1p(jnp.exp(-jnp.abs(x)))
    return d_loss, jnp.mean(bce)


if __name__ == "__main__":
    key = jax.random.PRNGKey(0)
    k1, k2 = jax.random.split(key)

    # Small bag: N slice depth-predictions (N, 1) + one bag logit / label.
    N = 8
    depth_predictions = 5.0 * jax.random.normal(k1, (N, 1), dtype=jnp.float32)
    z_spacing, nth_slice = 2.5, 3.0
    tumor_prob = jax.random.normal(k2, (1,), dtype=jnp.float32)
    bag_label = jnp.ones((1,), dtype=jnp.float32)

    d_loss, c_loss = compass_loss(depth_predictions, z_spacing, nth_slice,
                                  tumor_prob, bag_label, step=1.0)
    jax.block_until_ready((d_loss, c_loss))
    d_ref, c_ref = _reference(depth_predictions, z_spacing, nth_slice,
                              tumor_prob, bag_label, step=1.0)
    np.testing.assert_allclose(np.asarray(d_loss), np.asarray(d_ref),
                               rtol=1e-3, atol=1e-6)
    np.testing.assert_allclose(np.asarray(c_loss), np.asarray(c_ref),
                               rtol=1e-3, atol=1e-6)

    # Larger bag exercises the tiled path: 3x3 block grid, upper tiles skipped.
    N2 = 600
    k3, k4 = jax.random.split(k2)
    dp2 = 4.0 * jax.random.normal(k3, (N2, 1), dtype=jnp.float32)
    tp2 = jax.random.normal(k4, (1,), dtype=jnp.float32)
    bl2 = jnp.zeros((1,), dtype=jnp.float32)
    d2_, c2_ = compass_loss(dp2, 1.5, 5.0, tp2, bl2, step=1.0)
    jax.block_until_ready((d2_, c2_))
    d2r, c2r = _reference(dp2, 1.5, 5.0, tp2, bl2, step=1.0)
    np.testing.assert_allclose(np.asarray(d2_), np.asarray(d2r),
                               rtol=1e-3, atol=1e-5)
    np.testing.assert_allclose(np.asarray(c2_), np.asarray(c2r),
                               rtol=1e-3, atol=1e-6)

    print("KERNEL_OK")
</pallas_src>

<mosaic_0001>
module attributes {stable_mosaic.version = 11 : i64} {
  func.func @_compass_kernel(%arg0: i32, %arg1: i32, %arg2: memref<1x1xf32, #tpu.memory_space<smem>>, %arg3: memref<8x1xf32, #tpu.memory_space<vmem>>, %arg4: memref<1x8xf32, #tpu.memory_space<vmem>>, %arg5: memref<2x1xf32, #tpu.memory_space<vmem>>, %arg6: memref<1x8x128xf32, #tpu.memory_space<vmem>>) attributes {dimension_semantics = [#tpu.dimension_semantics<parallel>, #tpu.dimension_semantics<arbitrary>], iteration_bounds = array<i64: 1, 1>, scalar_prefetch = 0 : i64, scratch_operands = 0 : i64, tpu.core_type = #tpu.core_type<tc>, window_params = [{transform_indices = @transform_0, window_bounds = array<i64: 1, 1>}, {transform_indices = @transform_1, window_bounds = array<i64: 8, 1>}, {transform_indices = @transform_2, window_bounds = array<i64: 1, 8>}, {pipeline_mode = #tpu.pipeline_mode<synchronous>, transform_indices = @transform_3, window_bounds = array<i64: 2, 1>}, {transform_indices = @transform_4, window_bounds = array<i64: 1, 8, 128>}]} {
    %0 = tpu.iota {dimensions = array<i32: 1>} : vector<1x8x128xi32>
    %1 = tpu.iota {dimensions = array<i32: 2>} : vector<1x8x128xi32>
    %c0_i32 = arith.constant 0 : i32
    %2 = arith.cmpi eq, %arg1, %c0_i32 : i32
    %3 = arith.extui %2 : i1 to i32
    %c0_i32_0 = arith.constant 0 : i32
    %4 = arith.cmpi ne, %3, %c0_i32_0 : i32
    scf.if %4 {
      %c0 = arith.constant 0 : index
      %c0_2 = arith.constant 0 : index
      %8 = vector.load %arg5[%c0, %c0_2] : memref<2x1xf32, #tpu.memory_space<vmem>>, vector<1x1xf32>
      %c1 = arith.constant 1 : index
      %c0_3 = arith.constant 0 : index
      %9 = vector.load %arg5[%c1, %c0_3] : memref<2x1xf32, #tpu.memory_space<vmem>>, vector<1x1xf32>
      %cst = arith.constant 0.000000e+00 : f32
      %10 = vector.broadcast %cst : f32 to vector<1x1xf32>
      %11 = arith.maximumf %8, %10 : vector<1x1xf32>
      %12 = arith.mulf %8, %9 : vector<1x1xf32>
      %13 = arith.subf %11, %12 : vector<1x1xf32>
      %14 = math.absf %8 : vector<1x1xf32>
      %cst_4 = arith.constant 0.000000e+00 : f32
      %15 = vector.broadcast %cst_4 : f32 to vector<1x1xf32>
      %16 = arith.subf %15, %14 : vector<1x1xf32>
      %17 = math.exp %16 : vector<1x1xf32>
      %18 = math.log1p %17 : vector<1x1xf32>
      %19 = arith.addf %13, %18 : vector<1x1xf32>
      %20 = vector.shape_cast %19 : vector<1x1xf32> to vector<1x1x1xf32>
      %cst_5 = arith.constant dense<0.000000e+00> : vector<1xf32>
      %21 = vector.multi_reduction <add>, %20, %cst_5 [1, 2] : vector<1x1x1xf32> to vector<1xf32>
      %22 = vector.shape_cast %21 : vector<1xf32> to vector<1x1x1xf32>
      %23 = vector.extract %22[0, 0, 0] : f32 from vector<1x1x1xf32>
      %cst_6 = arith.constant 1.000000e+00 : f32
      %24 = arith.mulf %23, %cst_6 : f32
      %c0_i32_7 = arith.constant 0 : i32
      %25 = vector.broadcast %c0_i32_7 : i32 to vector<1x8x128xi32>
      %26 = arith.cmpi eq, %0, %25 : vector<1x8x128xi32>
      %c1_i32 = arith.constant 1 : i32
      %27 = vector.broadcast %c1_i32 : i32 to vector<1x8x128xi32>
      %28 = arith.cmpi eq, %1, %27 : vector<1x8x128xi32>
      %29 = arith.andi %26, %28 : vector<1x8x128xi1>
      %cst_8 = arith.constant 0.000000e+00 : f32
      %30 = vector.broadcast %24 : f32 to vector<1x8x128xf32>
      %31 = vector.broadcast %cst_8 : f32 to vector<1x8x128xf32>
      %32 = arith.select %29, %30, %31 : vector<1x8x128xi1>, vector<1x8x128xf32>
      %c0_9 = arith.constant 0 : index
      %c0_10 = arith.constant 0 : index
      %c0_11 = arith.constant 0 : index
      %33 = vector.load %arg6[%c0_9, %c0_10, %c0_11] : memref<1x8x128xf32, #tpu.memory_space<vmem>>, vector<1x8x128xf32>
      tpu.vector_store %arg6[%c0_9, %c0_10, %c0_11], %32 {strides = array<i32>} : memref<1x8x128xf32, #tpu.memory_space<vmem>>, vector<1x8x128xf32>,
    } else {
    }
    %5 = arith.cmpi sle, %arg1, %arg0 : i32
    %6 = arith.extui %5 : i1 to i32
    %c0_i32_1 = arith.constant 0 : i32
    %7 = arith.cmpi ne, %6, %c0_i32_1 : i32
    scf.if %7 {
      %c0 = arith.constant 0 : index
      %c0_2 = arith.constant 0 : index
      %8 = memref.load %arg2[%c0, %c0_2] : memref<1x1xf32, #tpu.memory_space<smem>>
      %9 = tpu.iota {dimensions = array<i32: 0>} : vector<8x8xi32>
      %c8_i32 = arith.constant 8 : i32
      %10 = arith.muli %arg0, %c8_i32 : i32
      %11 = vector.broadcast %10 : i32 to vector<8x8xi32>
      %12 = arith.addi %9, %11 : vector<8x8xi32>
      %13 = tpu.iota {dimensions = array<i32: 1>} : vector<8x8xi32>
      %c8_i32_3 = arith.constant 8 : i32
      %14 = arith.muli %arg1, %c8_i32_3 : i32
      %15 = vector.broadcast %14 : i32 to vector<8x8xi32>
      %16 = arith.addi %13, %15 : vector<8x8xi32>
      %17 = arith.subi %12, %16 : vector<8x8xi32>
      %18 = math.absi %17 : vector<8x8xi32>
      %19 = arith.sitofp %18 : vector<8x8xi32> to vector<8x8xf32>
      %20 = vector.broadcast %8 : f32 to vector<8x8xf32>
      %21 = arith.mulf %19, %20 : vector<8x8xf32>
      %c0_4 = arith.constant 0 : index
      %c0_5 = arith.constant 0 : index
      %22 = vector.load %arg3[%c0_4, %c0_5] : memref<8x1xf32, #tpu.memory_space<vmem>>, vector<8x1xf32>
      %c0_6 = arith.constant 0 : index
      %c0_7 = arith.constant 0 : index
      %23 = vector.load %arg4[%c0_6, %c0_7] : memref<1x8xf32, #tpu.memory_space<vmem>>, vector<1x8xf32>
      %24 = vector.broadcast %22 : vector<8x1xf32> to vector<8x8xf32>
      %25 = vector.broadcast %23 : vector<1x8xf32> to vector<8x8xf32>
      %26 = arith.subf %24, %25 : vector<8x8xf32>
      %cst = arith.constant 0.000000e+00 : f32
      %27 = vector.broadcast %cst : f32 to vector<8x8xf32>
      %28 = arith.cmpf oge, %26, %27 : vector<8x8xf32>
      %cst_8 = arith.constant 2.000000e-01 : f32
      %29 = vector.broadcast %cst_8 : f32 to vector<8x8xf32>
      %30 = arith.mulf %29, %21 : vector<8x8xf32>
      %31 = arith.subf %26, %30 : vector<8x8xf32>
      %32 = arith.select %28, %31, %26 : vector<8x8xi1>, vector<8x8xf32>
      %cst_9 = arith.constant 0.000000e+00 : f32
      %33 = vector.broadcast %cst_9 : f32 to vector<8x8xf32>
      %34 = arith.cmpf oge, %32, %33 : vector<8x8xf32>
      %cst_10 = arith.constant 8.000000e-01 : f32
      %35 = vector.broadcast %cst_10 : f32 to vector<8x8xf32>
      %36 = arith.mulf %35, %21 : vector<8x8xf32>
      %37 = arith.subf %32, %36 : vector<8x8xf32>
      %cst_11 = arith.constant 0.000000e+00 : f32
      %38 = vector.broadcast %cst_11 : f32 to vector<8x8xf32>
      %39 = arith.maximumf %37, %38 : vector<8x8xf32>
      %40 = arith.select %34, %39, %32 : vector<8x8xi1>, vector<8x8xf32>
      %41 = arith.cmpi sge, %12, %16 : vector<8x8xi32>
      %c8_i32_12 = arith.constant 8 : i32
      %42 = vector.broadcast %c8_i32_12 : i32 to vector<8x8xi32>
      %43 = arith.cmpi slt, %12, %42 : vector<8x8xi32>
      %44 = arith.andi %41, %43 : vector<8x8xi1>
      %c8_i32_13 = arith.constant 8 : i32
      %45 = vector.broadcast %c8_i32_13 : i32 to vector<8x8xi32>
      %46 = arith.cmpi slt, %16, %45 : vector<8x8xi32>
      %47 = arith.andi %44, %46 : vector<8x8xi1>
      %48 = math.absf %40 : vector<8x8xf32>
      %cst_14 = arith.constant 0.000000e+00 : f32
      %49 = vector.broadcast %cst_14 : f32 to vector<8x8xf32>
      %50 = arith.select %47, %48, %49 : vector<8x8xi1>, vector<8x8xf32>
      %51 = vector.shape_cast %50 : vector<8x8xf32> to vector<1x8x8xf32>
      %cst_15 = arith.constant dense<0.000000e+00> : vector<1xf32>
      %52 = vector.multi_reduction <add>, %51, %cst_15 [1, 2] : vector<1x8x8xf32> to vector<1xf32>
      %53 = vector.shape_cast %52 : vector<1xf32> to vector<1x1x1xf32>
      %54 = vector.extract %53[0, 0, 0] : f32 from vector<1x1x1xf32>
      %c0_16 = arith.constant 0 : index
      %c0_17 = arith.constant 0 : index
      %c0_18 = arith.constant 0 : index
      %55 = vector.load %arg6[%c0_16, %c0_17, %c0_18] : memref<1x8x128xf32, #tpu.memory_space<vmem>>, vector<1x8x128xf32>
      %c0_i32_19 = arith.constant 0 : i32
      %56 = vector.broadcast %c0_i32_19 : i32 to vector<1x8x128xi32>
      %57 = arith.cmpi eq, %0, %56 : vector<1x8x128xi32>
      %c0_i32_20 = arith.constant 0 : i32
      %58 = vector.broadcast %c0_i32_20 : i32 to vector<1x8x128xi32>
      %59 = arith.cmpi eq, %1, %58 : vector<1x8x128xi32>
      %60 = arith.andi %57, %59 : vector<1x8x128xi1>
      %cst_21 = arith.constant 0.000000e+00 : f32
      %61 = vector.broadcast %54 : f32 to vector<1x8x128xf32>
      %62 = vector.broadcast %cst_21 : f32 to vector<1x8x128xf32>
      %63 = arith.select %60, %61, %62 : vector<1x8x128xi1>, vector<1x8x128xf32>
      %64 = arith.addf %55, %63 : vector<1x8x128xf32>
      %c0_22 = arith.constant 0 : index
      %c0_23 = arith.constant 0 : index
      %c0_24 = arith.constant 0 : index
      %65 = vector.load %arg6[%c0_22, %c0_23, %c0_24] : memref<1x8x128xf32, #tpu.memory_space<vmem>>, vector<1x8x128xf32>
      tpu.vector_store %arg6[%c0_22, %c0_23, %c0_24], %64 {strides = array<i32>} : memref<1x8x128xf32, #tpu.memory_space<vmem>>, vector<1x8x128xf32>,
    } else {
    }
    return
  }
  func.func @transform_0(%arg0: i32, %arg1: i32) -> (i32, i32) {
    %c0_i32 = arith.constant 0 : i32
    %c0_i32_0 = arith.constant 0 : i32
    %c0_i32_1 = arith.constant 0 : i32
    return %c0_i32, %c0_i32_0 : i32, i32
  }
  func.func @transform_1(%arg0: i32, %arg1: i32) -> (i32, i32) {
    %c0_i32 = arith.constant 0 : i32
    %c0_i32_0 = arith.constant 0 : i32
    return %arg0, %c0_i32 : i32, i32
  }
  func.func @transform_2(%arg0: i32, %arg1: i32) -> (i32, i32) {
    %c0_i32 = arith.constant 0 : i32
    %c0_i32_0 = arith.constant 0 : i32
    return %c0_i32, %arg1 : i32, i32
  }
  func.func @transform_3(%arg0: i32, %arg1: i32) -> (i32, i32) {
    %c0_i32 = arith.constant 0 : i32
    %c0_i32_0 = arith.constant 0 : i32
    %c0_i32_1 = arith.constant 0 : i32
    return %c0_i32, %c0_i32_0 : i32, i32
  }
  func.func @transform_4(%arg0: i32, %arg1: i32) -> (i32, i32, i32) {
    %c0_i32 = arith.constant 0 : i32
    %c0_i32_0 = arith.constant 0 : i32
    %c0_i32_1 = arith.constant 0 : i32
    return %arg0, %c0_i32, %c0_i32_0 : i32, i32, i32
  }
}

</mosaic_0001>

<bundles_post_ra>
// kernel: tpu_custom_call.1
= control target key start
LH: loop header
LB: loop body
LE: loop exit
PB: predicated region body
PF: predicated region fallthrough
CT: control target
= control target key end

     0   :  { %v172_v1 = vmov 0   ;;  %s229_s0 = inlined_call_operand.<no memory space> [shape: f32[1,1], index: 0, kind: input, shape index: {}]   ;;  %s230_s1 = inlined_call_operand.vmem [shape: f32[8,1], index: 1, kind: input, shape index: {}]   ;;  %s231_s2 = inlined_call_operand.vmem [shape: f32[1,8], index: 2, kind: input, shape index: {}]   ;;  %s232_s3 = inlined_call_operand.vmem [shape: f32[2,1], index: 3, kind: input, shape index: {}]   ;;  %s233_s4 = inlined_call_operand.hbm [shape: f32[1,8,128], index: 4, kind: output, shape index: {}]  }
   0x1   :  { %v72_v0 = vld [vmem:[%s230_s1] sm:$0xff]  ;;  %140 = vset.pattern.permute.xlu0 %v172_v1 }
   0x2   :  { %10 = vsyncpa [#allocation4], 0  ;;  %76 = vperm.xlu0 %140, %v72_v0   ;;  %v19_v2 = vlaneseq  ;;  %v70_v9 = vstv %s229_s0  ;;  %v141_v11 = vld [vmem:[%s231_s2] ss:$0 sm:$0xff]  ;;  %vm99_vm6 = vcmask 64512   ;;  %s173_s22 = smov [#allocation3]  }
   0x3   :  { %v27_v24 = vld [vmem:[%s232_s3] sm:$0x1]  ;;  %v28_v31 = vld [vmem:[%s232_s3 + $0x1] sm:$0x1]  ;;  %s123_s23 = sshll.u32 %s173_s22, 4  ;;  %s125_s27 = sshll.u32 %s233_s4, 4  ;;  %s124_s23 = int_to_ptr.vmem [resolvable:$true] %s123_s23  ;;  %s126_s27 = int_to_ptr.hbm [resolvable:$true] %s125_s27 }
   0x4   :  { %v202_v3 = vshrl.u32 %v19_v2, 7  ;;  %v204_v4 = vand.u32 127, %v19_v2  ;;  %v32_v25 = vand.u32 2147483647, %v27_v24  ;;  %v29_v34 = vmax.f32 %v27_v24, 0.0 }
   0x5   :  { %v30_v35 = vmul.f32 %v28_v31, %v27_v24 }
   0x6   :  { %v65_v5 = vsub.s32 %v202_v3, %v204_v4  ;;  %vm92_vm2 = vcmp.ge.s32.totalorder %v202_v3, %v204_v4  ;;  %vm95_vm3 = vcmp.lt.s32.totalorder %v204_v4, 8  ;;  %v33_v26 = vsub.f32 0.0, %v32_v25 }
   0x7   :  { %vm96_vm5 = vmand %vm92_vm2, %vm95_vm3  ;;  %v31_v39 = vsub.f32 %v29_v34, %v30_v35  ;;  %vm48_vm8 = vcmp.eq.s32.totalorder %v202_v3, 0  ;;  %vm49_vm9 = vcmp.eq.s32.totalorder %v204_v4, 1  ;;  %vm112_vm10 = vcmp.eq.s32.totalorder %v204_v4, 0 }
   0x8   :  { %v67_v6 = vsub.s32 0, %v65_v5  ;;  %vm66_vm0 = vcmp.lt.s32.totalorder %v65_v5, 0  ;;  %v34_v27 = vmul.f32 1.442695, %v33_v26  ;;  %vm50_vm11 = vmand %vm48_vm8, %vm49_vm9 }
   0x9   :  { %vm113_vm12 = vmand %vm48_vm8, %vm112_vm10 }
   0xa   :  { %v68_v7 = vsel %vm66_vm0, %v67_v6, %v65_v5  ;;  %142 = vpow2.f32 %v34_v27 }
   0xb   :  { %v69_v8 = vcvt.s32.f32 %v68_v7 }
   0xd   :  { %v71_v10 = vmul.f32 %v70_v9, %v69_v8 }
   0xf   :  { %v84_v12 = vmul.f32 0.2, %v71_v10  ;;  %v88_v15 = vmul.f32 0.8, %v71_v10 }
  0x10   :  { %v143_v28 = vpop.eup %142 }
  0x11   :  { %v36_v29 = vadd.f32 1.0, %v143_v28  ;;  %v39_v30 = vmul.f32 -0.5, %v143_v28  ;;  %v42_v36 = vand.u32 2147483647, %v143_v28 }
  0x13   :  { %144 = vlog2.f32 %v36_v29  ;;  %v40_v32 = vadd.f32 1.0, %v39_v30  ;;  %vm43_vm7 = vcmp.lt.f32.partialorder %v42_v36, 0.0004427343 }
  0x15   :  { %v41_v38 = vmul.f32 %v143_v28, %v40_v32 }
  0x19   :  { %v145_v33 = vpop.eup %144 }
  0x1a   :  { %v38_v37 = vmul.f32 0.6931472, %v145_v33 }
  0x1c   :  { %v44_v40 = vsel %vm43_vm7, %v41_v38, %v38_v37 }
  0x1d   :  { %v45_v41 = vadd.f32 %v44_v40, %v31_v39 }
  0x1f   :  { %134 = vpush %v45_v41 }
  0x50   :  { %s135_s3 = spop %134 }
  0x51   :  { %v51_v49 = vstv %s135_s3 }
  0x52   :  { %v52_v50 = vsel %vm50_vm11, %v51_v49, 0.0 }
  0x74   :  { %v77_v13 = vpop.permute.xlu0 %76 }
  0x75   :  { %v82_v14 = vsub.f32 %v77_v13, %v141_v11 }
  0x77   :  { %vm83_vm1 = vcmp.ge.f32.partialorder %v82_v14, 0.0  ;;  %v85_v16 = vsub.f32 %v82_v14, %v84_v12 }
  0x79   :  { %v86_v17 = vsel %vm83_vm1, %v85_v16, %v82_v14 }
  0x7a   :  { %v89_v18 = vsub.f32 %v86_v17, %v88_v15  ;;  %vm87_vm4 = vcmp.ge.f32.partialorder %v86_v17, 0.0 }
  0x7c   :  { %v90_v19 = vmax.f32 %v89_v18, 0.0 }
  0x7e   :  { %v91_v20 = vsel %vm87_vm4, %v90_v19, %v86_v17 }
  0x7f   :  { %v97_v21 = vand.u32 2147483647, %v91_v20 }
  0x81   :  { %v98_v22 = vsel %vm96_vm5, %v97_v21, 0.0 }
  0x82   :  { %v100_v23 = vsel %vm99_vm6, %v98_v22, 0.0 }
  0x83   :  { %101 = vadd.xlane.f32.xlu0 %v100_v23 }
  0xf6   :  { %v102_v42 = vpop.xlane.xlu0 %101 }
  0xf7   :  { %v103_v43 = vrot.slane %v102_v42, 4 }
  0xf9   :  { %v104_v44 = vadd.f32 %v103_v43, %v102_v42 }
  0xfb   :  { %v105_v45 = vrot.slane %v104_v44, 2 }
  0xfd   :  { %v106_v46 = vadd.f32 %v105_v45, %v104_v44 }
  0xff   :  { %v107_v47 = vrot.slane %v106_v46, 1 }
 0x101   :  { %v108_v48 = vadd.f32 %v107_v47, %v106_v46 }
 0x103   :  { %136 = vpush %v108_v48 }
 0x134   :  { %s137_s24 = spop %136 }
 0x135   :  { %v114_v51 = vstv %s137_s24 }
 0x136   :  { %v115_v52 = vsel %vm113_vm12, %v114_v51, 0.0 }
 0x137   :  { %v116_v53 = vadd.f32 %v115_v52, %v52_v50 }
 0x139   :  { %117 = vst [vmem:[#allocation3] sm:$0xff] %v116_v53 }
 0x13a   :  { %128 = dma.vmem_to_hbm [thread:$0]  %s124_s23, 128, %s126_s27, [#allocation4]  }
 0x13b   :  { %170 = dma.done.wait [#allocation4], 128  }
 0x13c   :  { %171 = vsyncadd [#allocation4], 4294967168 }
 0x13d   :  { %133 = vsyncpa [#allocation4], 1 }

</bundles_post_ra>
